<compile_context>
chip_gen: v6e
topology: v6e:2x2x1
jax: 0.10.0
libtpu: 0.0.40
codegen_flags: <defaults>
</compile_context>

<pallas_src>
import jax
import jax.numpy as jnp
from jax.experimental import pallas as pl
from jax.experimental.pallas import tpu as pltpu


def bag_model_kernel(x_ref, wmask_ref, w1_ref, b1_ref, w2_ref, b2_ref, o_ref):
    bb, n = wmask_ref.shape
    h_dim = w1_ref.shape[1]

    # prepNN: one fused (BB*N, D_in) @ (D_in, H) MXU matmul for the whole block.
    h = jnp.dot(x_ref[...], w1_ref[...], preferred_element_type=jnp.float32)
    h = jnp.maximum(h + b1_ref[...], 0.0)                       # (BB*N, H), f32

    # mil.mean aggregation: the (instance < n) mask and the safe 1/n factor are
    # pre-folded into wmask, so this is a single VPU multiply + sublane reduce.
    h = h.reshape(bb, n, h_dim)
    agg = jnp.sum(h * wmask_ref[...][:, :, None], axis=1)       # (BB, H), f32

    # afterNN: (BB, H) @ (H, K_pad) -> lane-dense (BB, K_pad) store.
    o_ref[...] = (
        jnp.dot(agg.astype(w2_ref.dtype), w2_ref[...],
                preferred_element_type=jnp.float32)
        + b2_ref[...]
    )


def _round_up(v, m):
    return ((v + m - 1) // m) * m


def bag_model_3d(x, n_instances, w1, b1, w2, b2, *,
                 bag_block=None, matmul_dtype=jnp.float32):
    B, N, D_in = x.shape
    H = w1.shape[1]
    K = w2.shape[1]

    # Bag block: multiple of 8 (sublane-dense output) and big enough that the
    # fused prepNN matmul has M = BB*N >= 256 (full MXU width on v6e/v7x).
    if bag_block is None:
        bag_block = min(_round_up(max(8, pl.cdiv(256, N)), 8), _round_up(B, 8))
    bag_block = max(8, _round_up(bag_block, 8))
    B_pad = _round_up(B, bag_block)
    K_pad = _round_up(K, 128)   # lane-dense output store (biggest measured lever)

    # Pad bags; padded bags get n = 0 (weight 0 everywhere) and are sliced off.
    if B_pad != B:
        x = jnp.pad(x, ((0, B_pad - B), (0, 0), (0, 0)))
        n_instances = jnp.pad(n_instances, (0, B_pad - B))

    # Fold masking + safe mean into one per-(bag, instance) weight:
    #   w_mask[b, j] = (j < n_b) / clip(n_b, 1, N)
    n_eff = jnp.clip(n_instances, 1, N).astype(jnp.float32)
    inst = jnp.arange(N, dtype=n_instances.dtype)[None, :]
    w_mask = (inst < n_instances[:, None]).astype(jnp.float32) / n_eff[:, None]

    # Matmul operands (optionally bf16 on v6e/v7x); biases stay f32 and are
    # added to the f32 accumulator; all elementwise work stays f32 (v5e-safe).
    x_mm = x.reshape(B_pad * N, D_in).astype(matmul_dtype)
    w1_mm = w1.astype(matmul_dtype)
    w2_mm = jnp.pad(w2, ((0, 0), (0, K_pad - K))).astype(matmul_dtype)
    b1_f = b1.astype(jnp.float32)
    b2_f = jnp.pad(b2, ((0, 0), (0, K_pad - K))).astype(jnp.float32)

    bb = bag_block
    grid = (B_pad // bb,)
    out = pl.pallas_call(
        bag_model_kernel,
        out_shape=jax.ShapeDtypeStruct((B_pad, K_pad), jnp.float32),
        grid=grid,
        in_specs=[
            pl.BlockSpec((bb * N, D_in), lambda i: (i, 0)),   # x, bags flattened
            pl.BlockSpec((bb, N),        lambda i: (i, 0)),   # per-instance weights
            pl.BlockSpec((D_in, H),      lambda i: (0, 0)),   # w1 (resident)
            pl.BlockSpec((1, H),         lambda i: (0, 0)),   # b1
            pl.BlockSpec((H, K_pad),     lambda i: (0, 0)),   # w2 (lane-padded)
            pl.BlockSpec((1, K_pad),     lambda i: (0, 0)),   # b2
        ],
        out_specs=pl.BlockSpec((bb, K_pad), lambda i: (i, 0)),
        compiler_params=pltpu.CompilerParams(
            dimension_semantics=("parallel",)),
        # NOTE: for large D_in/H set vmem_limit_bytes here and shrink bag_block
        # on v7x (64 MiB VMEM); the resident weight specs could additionally use
        # pipeline_mode=pl.Buffered(1) to drop their second VMEM buffer.
    )(x_mm, w_mask, w1_mm, b1_f, w2_mm, b2_f)

    return out[:B, :K]


def bag_model_3d_ref(x, n_instances, w1, b1, w2, b2):
    """Pure-JAX reference (mirrors the PyTorch forward with mean aggregation)."""
    B, N, _ = x.shape
    h = jnp.maximum(jnp.einsum("bnd,dh->bnh", x, w1) + b1[None, :, :], 0.0)
    mask = (jnp.arange(N)[None, :, None] < n_instances[:, None, None]).astype(
        jnp.float32)
    denom = jnp.clip(n_instances, 1, N).astype(jnp.float32)[:, None]
    agg = (h * mask).sum(axis=1) / denom
    return agg @ w2 + b2[0]


if __name__ == "__main__":
    # 64 bags, max 8 instances, 32 input features, hidden 32, 4 outputs.
    # With bag_block = 32 the prepNN matmul is (256, 32)@(32, 32) per step and
    # the grid has 2 parallel steps (even -> both v7x TensorCores busy).
    B, N, D_in, H, K = 64, 8, 32, 32, 4

    key = jax.random.PRNGKey(0)
    kx, kn, kw1, kb1, kw2, kb2 = jax.random.split(key, 6)

    x = jax.random.normal(kx, (B, N, D_in), dtype=jnp.float32)
    n_instances = jax.random.randint(kn, (B,), 1, N + 1).astype(jnp.int32)

    w1 = jax.random.normal(kw1, (D_in, H), dtype=jnp.float32) * 0.1
    b1 = jax.random.normal(kb1, (1, H), dtype=jnp.float32) * 0.1
    w2 = jax.random.normal(kw2, (H, K), dtype=jnp.float32) * 0.1
    b2 = jax.random.normal(kb2, (1, K), dtype=jnp.float32) * 0.1

    ref = bag_model_3d_ref(x, n_instances, w1, b1, w2, b2)

    # f32 matmul operands (v5e-friendly; tight check against the JAX reference).
    out = jax.block_until_ready(bag_model_3d(x, n_instances, w1, b1, w2, b2))
    assert out.shape == (B, K)
    assert jnp.allclose(out, ref, atol=1e-4, rtol=1e-4), (out, ref)

    # bf16 matmul operands (recommended on v6e/v7x); f32 accumulation.
    out_bf16 = jax.block_until_ready(
        bag_model_3d(x, n_instances, w1, b1, w2, b2, matmul_dtype=jnp.bfloat16))
    assert jnp.allclose(out_bf16, ref, atol=5e-2, rtol=5e-2), (out_bf16, ref)

    print("KERNEL_OK")
</pallas_src>

<mosaic_0001>
module attributes {stable_mosaic.version = 11 : i64} {
  func.func @bag_model_kernel(%arg0: i32, %arg1: memref<256x32xf32, #tpu.memory_space<vmem>>, %arg2: memref<32x8xf32, #tpu.memory_space<vmem>>, %arg3: memref<32x32xf32, #tpu.memory_space<vmem>>, %arg4: memref<1x32xf32, #tpu.memory_space<vmem>>, %arg5: memref<32x128xf32, #tpu.memory_space<vmem>>, %arg6: memref<1x128xf32, #tpu.memory_space<vmem>>, %arg7: memref<32x128xf32, #tpu.memory_space<vmem>>) attributes {dimension_semantics = [#tpu.dimension_semantics<parallel>], iteration_bounds = array<i64: 2>, scalar_prefetch = 0 : i64, scratch_operands = 0 : i64, tpu.core_type = #tpu.core_type<tc>, window_params = [{transform_indices = @transform_0, window_bounds = array<i64: 256, 32>}, {transform_indices = @transform_1, window_bounds = array<i64: 32, 8>}, {pipeline_mode = #tpu.pipeline_mode<synchronous>, transform_indices = @transform_2, window_bounds = array<i64: 32, 32>}, {pipeline_mode = #tpu.pipeline_mode<synchronous>, transform_indices = @transform_3, window_bounds = array<i64: 1, 32>}, {pipeline_mode = #tpu.pipeline_mode<synchronous>, transform_indices = @transform_4, window_bounds = array<i64: 32, 128>}, {pipeline_mode = #tpu.pipeline_mode<synchronous>, transform_indices = @transform_5, window_bounds = array<i64: 1, 128>}, {transform_indices = @transform_6, window_bounds = array<i64: 32, 128>}]} {
    %c0 = arith.constant 0 : index
    %c0_0 = arith.constant 0 : index
    %0 = vector.load %arg1[%c0, %c0_0] : memref<256x32xf32, #tpu.memory_space<vmem>>, vector<256x32xf32>
    %c0_1 = arith.constant 0 : index
    %c0_2 = arith.constant 0 : index
    %1 = vector.load %arg3[%c0_1, %c0_2] : memref<32x32xf32, #tpu.memory_space<vmem>>, vector<32x32xf32>
    %cst = arith.constant dense<0.000000e+00> : vector<256x32xf32>
    %2 = tpu.matmul %0, %1, %cst {dimension_numbers = #tpu.dot_dimension_numbers<[1], [0], [0], [1], [0, 0, 1, 1], [], []>} : vector<256x32xf32>, vector<32x32xf32>, vector<256x32xf32> -> vector<256x32xf32>
    %c0_3 = arith.constant 0 : index
    %c0_4 = arith.constant 0 : index
    %3 = vector.load %arg4[%c0_3, %c0_4] : memref<1x32xf32, #tpu.memory_space<vmem>>, vector<1x32xf32>
    %4 = vector.broadcast %3 : vector<1x32xf32> to vector<256x32xf32>
    %5 = arith.addf %2, %4 : vector<256x32xf32>
    %cst_5 = arith.constant 0.000000e+00 : f32
    %6 = vector.broadcast %cst_5 : f32 to vector<256x32xf32>
    %7 = arith.maximumf %5, %6 : vector<256x32xf32>
    %8 = vector.shape_cast %7 : vector<256x32xf32> to vector<32x8x32xf32>
    %c0_6 = arith.constant 0 : index
    %c0_7 = arith.constant 0 : index
    %9 = vector.load %arg2[%c0_6, %c0_7] : memref<32x8xf32, #tpu.memory_space<vmem>>, vector<32x8xf32>
    %10 = vector.shape_cast %9 : vector<32x8xf32> to vector<32x8x1xf32>
    %11 = vector.broadcast %10 : vector<32x8x1xf32> to vector<32x8x32xf32>
    %12 = arith.mulf %8, %11 : vector<32x8x32xf32>
    %cst_8 = arith.constant dense<0.000000e+00> : vector<32x32xf32>
    %13 = vector.multi_reduction <add>, %12, %cst_8 [1] : vector<32x8x32xf32> to vector<32x32xf32>
    %c0_9 = arith.constant 0 : index
    %c0_10 = arith.constant 0 : index
    %14 = vector.load %arg5[%c0_9, %c0_10] : memref<32x128xf32, #tpu.memory_space<vmem>>, vector<32x128xf32>
    %cst_11 = arith.constant dense<0.000000e+00> : vector<32x128xf32>
    %15 = tpu.matmul %13, %14, %cst_11 {dimension_numbers = #tpu.dot_dimension_numbers<[1], [0], [0], [1], [0, 0, 1, 1], [], []>} : vector<32x32xf32>, vector<32x128xf32>, vector<32x128xf32> -> vector<32x128xf32>
    %c0_12 = arith.constant 0 : index
    %c0_13 = arith.constant 0 : index
    %16 = vector.load %arg6[%c0_12, %c0_13] : memref<1x128xf32, #tpu.memory_space<vmem>>, vector<1x128xf32>
    %17 = vector.broadcast %16 : vector<1x128xf32> to vector<32x128xf32>
    %18 = arith.addf %15, %17 : vector<32x128xf32>
    %c0_14 = arith.constant 0 : index
    %c0_15 = arith.constant 0 : index
    %19 = vector.load %arg7[%c0_14, %c0_15] : memref<32x128xf32, #tpu.memory_space<vmem>>, vector<32x128xf32>
    tpu.vector_store %arg7[%c0_14, %c0_15], %18 {strides = array<i32>} : memref<32x128xf32, #tpu.memory_space<vmem>>, vector<32x128xf32>,
    return
  }
  func.func @transform_0(%arg0: i32) -> (i32, i32) {
    %c0_i32 = arith.constant 0 : i32
    %c0_i32_0 = arith.constant 0 : i32
    return %arg0, %c0_i32 : i32, i32
  }
  func.func @transform_1(%arg0: i32) -> (i32, i32) {
    %c0_i32 = arith.constant 0 : i32
    %c0_i32_0 = arith.constant 0 : i32
    return %arg0, %c0_i32 : i32, i32
  }
  func.func @transform_2(%arg0: i32) -> (i32, i32) {
    %c0_i32 = arith.constant 0 : i32
    %c0_i32_0 = arith.constant 0 : i32
    %c0_i32_1 = arith.constant 0 : i32
    return %c0_i32, %c0_i32_0 : i32, i32
  }
  func.func @transform_3(%arg0: i32) -> (i32, i32) {
    %c0_i32 = arith.constant 0 : i32
    %c0_i32_0 = arith.constant 0 : i32
    %c0_i32_1 = arith.constant 0 : i32
    return %c0_i32, %c0_i32_0 : i32, i32
  }
  func.func @transform_4(%arg0: i32) -> (i32, i32) {
    %c0_i32 = arith.constant 0 : i32
    %c0_i32_0 = arith.constant 0 : i32
    %c0_i32_1 = arith.constant 0 : i32
    return %c0_i32, %c0_i32_0 : i32, i32
  }
  func.func @transform_5(%arg0: i32) -> (i32, i32) {
    %c0_i32 = arith.constant 0 : i32
    %c0_i32_0 = arith.constant 0 : i32
    %c0_i32_1 = arith.constant 0 : i32
    return %c0_i32, %c0_i32_0 : i32, i32
  }
  func.func @transform_6(%arg0: i32) -> (i32, i32) {
    %c0_i32 = arith.constant 0 : i32
    %c0_i32_0 = arith.constant 0 : i32
    return %arg0, %c0_i32 : i32, i32
  }
}

</mosaic_0001>

<bundles_post_ra>
// kernel: tpu_custom_call.1
= control target key start
LH: loop header
LB: loop body
LE: loop exit
PB: predicated region body
PF: predicated region fallthrough
CT: control target
= control target key end

     0   :  { %11 = vsyncpa [#allocation3], 0  ;;  %s2238_s0 = inlined_call_operand.vmem [shape: f32[512,32], index: 0, kind: input, shape index: {}]   ;;  %s2239_s1 = inlined_call_operand.vmem [shape: f32[64,8], index: 1, kind: input, shape index: {}]   ;;  %s2240_s2 = inlined_call_operand.vmem [shape: f32[32,32], index: 2, kind: input, shape index: {}]   ;;  %s2241_s3 = inlined_call_operand.vmem [shape: f32[1,32], index: 3, kind: input, shape index: {}]   ;;  %s2242_s4 = inlined_call_operand.vmem [shape: f32[32,128], index: 4, kind: input, shape index: {}]   ;;  %s2243_s5 = inlined_call_operand.vmem [shape: f32[1,128], index: 5, kind: input, shape index: {}]   ;;  %s2244_s6 = inlined_call_operand.hbm [shape: f32[64,128], index: 6, kind: output, shape index: {}]  }
   0x1   :  { %13 = vsyncpa [#allocation3 + $0x1], 0  ;;  %s1735_s21 = smov 0   ;;  %s1737_s22 = smov 0  }
   0x2   :  { %s1739_s23 = smov 0   ;;  %s1741_s24 = smov 0  }
   0x3 LB: > { %s1756_s25 = sadd.s32 4294967295, %s1695_s24   ;;  %s1419_s26 = sadd.s32 4294967294, %s1695_s24   ;;  %s1695_s24 = sphi %s1741_s24, %s2251_s24   ;;  %s1691_s23 = sphi %s1739_s23, %s2250_s23   ;;  %s1687_s22 = sphi %s1737_s22, %s2249_s22   ;;  %s1683_s21 = sphi %s1735_s21, %s2248_s21  }
   0x4   : > { %s1760_s27 = sadd.s32 1, %s1695_s24   ;;  %s162_s28 = sadd.s32 1, %s1691_s23 }
   0x5   : > { %s159_s29 = ssub.s32 %s1695_s24, %s1760_s27  ;;  %p172_p0 = scmp.ne.s32.totalorder %s1691_s23, %s1687_s22 }
   0x6   : > { %p160_p1 = scmp.eq.s32.totalorder %s159_s29, 0  ;;  %p173_p2 = scmp.eq.s32.totalorder %s1756_s25, 1 }
   0x7   : > { %p178_p3 = scmp.ne.s32.totalorder %s1687_s22, %s1683_s21  ;;  %p179_p4 = scmp.eq.s32.totalorder %s1419_s26, 1 }
   0x8   : > { %s1771_s30 = scalar_select %p160_p1, %s1691_s23, %s162_s28  }
   0x9   : > { %p1773_p5 = por %p173_p2, %p172_p0  ;;  %p1777_p6 = por %p179_p4, %p178_p3 }
   0xa   : > { %p1422_p7 = scmp.ge.s32.totalorder %s1695_s24, 1  ;;  %p227_p8 = scmp.lt.s32.totalorder %s1695_s24, 3 }
   0xc   : > { %p228_p9 = pnand %p1422_p7, %p227_p8 }
   0xd   : > { %s1424_s13 = sshll.u32 (!%p228_p9), %s1756_s25, 5  ;;  %s1426_s14 = sshll.u32 (!%p228_p9), %s1756_s25, 2 }
   0xe   : > { %231 = sbr.rel (%p228_p9) target bundleno = 528 (0x210), region = 44  ;;  %p263_p10 = scmp.lt.s32.totalorder (!%p228_p9), %s1424_s13, 63 }
   0xf   : > { %p1794_p11 = scmp.lt.s32.totalorder (!%p228_p9), %s1426_s14, 7 }
  0x13   : > { %v310_v0 = vld [vmem:[%s2240_s2 + $0x18] sm:$0xff]  ;;  %v309_v1 = vld [vmem:[%s2240_s2 + $0x10] sm:$0xff]  ;;  %v308_v2 = vld [vmem:[%s2240_s2 + $0x8] sm:$0xff]  ;;  %s2253_s13 = smov (!%p263_p10, %s1424_s13), 63  ;;  %vm318_vm0 = vcmask 261120   ;;  %v676_v4 = vlaneseq  ;;  %s2255_s14 = smov (!%p1794_p11, %s1426_s14), 7 }
  0x14   : > { %1516 = vmatprep.subr.mxu0 %v310_v0  ;;  %1586 = vmatprep.subr.mxu1 %v310_v0  ;;  %v307_v3 = vld [vmem:[%s2240_s2] sm:$0xff]  ;;  %s1425_s20 = sshll.u32 %s2253_s13, 3  ;;  %s1427_s9 = sshll.u32 %s2255_s14, 3  ;;  %vm1199_vm1 = vcmask 1041409   ;;  %vm1201_vm2 = vcmask 1042434   ;;  %vm1203_vm3 = vcmask 1043459  }
  0x15   : > { %1517 = vmatpush3.msra.mxu0 %v310_v0  ;;  %1590 = vmatpush3.msra.mxu1 %v310_v0  ;;  %s1804_s29 = scalar_lea.vmem %s2238_s0, %s1425_s20  ;;  %v1818_v11 = vshrl.u32 %v676_v4, 7  ;;  %s1831_s12 = scalar_lea.vmem %s2239_s1, %s1427_s9  ;;  %vm1205_vm4 = vcmask 1044484   ;;  %vm1207_vm5 = vcmask 1045509   ;;  %vm1209_vm6 = vcmask 1046534  }
  0x16   : > { %1518 = vmatprep.subr.mxu0 %v309_v1  ;;  %1587 = vmatprep.subr.mxu1 %v309_v1  ;;  %v275_v5 = vld [vmem:[%s1804_s29] sm:$0xff]  ;;  %v293_v6 = vld [vmem:[%s1804_s29 + $0x90] sm:$0xff]  ;;  %v276_v7 = vld [vmem:[%s1804_s29 + $0x8] sm:$0xff]  ;;  %vm1211_vm7 = vcmask 1047559   ;;  %s1471_s14 = sshll.u32 %s1756_s25, 9  ;;  %s1697_s25 = smov [#allocation2]  }
  0x17   : > { %1519 = vmatpush3.msra.mxu0 %v309_v1  ;;  %1591 = vmatpush3.msra.mxu1 %v309_v1  ;;  %v294_v8 = vld [vmem:[%s1804_s29 + $0x98] sm:$0xff]  ;;  %v277_v9 = vld [vmem:[%s1804_s29 + $0x10] sm:$0xff]  ;;  %v295_v10 = vld [vmem:[%s1804_s29 + $0xa0] sm:$0xff]  ;;  %v1834_v16 = vsub.s32 2, %v1818_v11  ;;  %v1843_v21 = vsub.s32 0, %v1818_v11  ;;  %v1846_v22 = vsub.s32 1, %v1818_v11  ;;  %s2196_s17 = scalar_lea.hbm %s2244_s6, %s1471_s14 }
  0x18   : > { %1520 = vmatprep.subr.mxu0 %v308_v2  ;;  %1588 = vmatprep.subr.mxu1 %v308_v2  ;;  %v278_v12 = vld [vmem:[%s1804_s29 + $0x18] sm:$0xff]  ;;  %v296_v13 = vld [vmem:[%s1804_s29 + $0xa8] sm:$0xff]  ;;  %v279_v14 = vld [vmem:[%s1804_s29 + $0x20] sm:$0xff]  ;;  %v1869_v32 = vsub.s32 3, %v1818_v11  ;;  %v1884_v39 = vsub.s32 4, %v1818_v11  ;;  %v1899_v46 = vsub.s32 5, %v1818_v11 }
  0x19   : > { %1521 = vmatpush3.msra.mxu0 %v308_v2  ;;  %1592 = vmatpush3.msra.mxu1 %v308_v2  ;;  %v297_v15 = vld [vmem:[%s1804_s29 + $0xb0] sm:$0xff]  ;;  %v280_v17 = vld [vmem:[%s1804_s29 + $0x28] sm:$0xff]  ;;  %v298_v18 = vld [vmem:[%s1804_s29 + $0xb8] sm:$0xff]  ;;  %v720_v57 = vsub.s32 6, %v1818_v11  ;;  %s1639_s20 = sshll.u32 %s1697_s25, 4  ;;  %s1640_s20 = int_to_ptr.vmem [resolvable:$false] %s1639_s20 }
  0x1a   : > { %1522 = vmatprep.subr.mxu0 %v307_v3  ;;  %1589 = vmatprep.subr.mxu1 %v307_v3  ;;  %v281_v19 = vld [vmem:[%s1804_s29 + $0x30] sm:$0xff]  ;;  %v299_v20 = vld [vmem:[%s1804_s29 + $0xc0] sm:$0xff]  ;;  %v1856_v25 = vld [vmem:[%s1831_s12 + $0x8] sm:$0xff]  ;;  %s1641_s26 = scalar_lea.vmem %s1640_s20, 1024 }
  0x1b   : > { %1523 = vmatpush3.msra.mxu0 %v307_v3  ;;  %1593 = vmatpush3.msra.mxu1 %v307_v3  ;;  %v1849_v23 = vld [vmem:[%s1831_s12] sm:$0xff]  ;;  %v282_v27 = vld [vmem:[%s1804_s29 + $0x38] sm:$0xff]  ;;  %v300_v28 = vld [vmem:[%s1804_s29 + $0xc8] sm:$0xff]  ;;  %v735_v31 = vrot.slane %v1856_v25, %v1843_v21  ;;  %v742_v40 = vrot.slane %v1856_v25, %v1846_v22  ;;  %v749_v47 = vrot.slane %v1856_v25, %v1834_v16  ;;  %v727_v3 = vsub.s32 7, %v1818_v11 }
  0x1c   : > { %1524 = vmatprep.mubr.msk.f32.mxu0 %vm318_vm0, %v275_v5  ;;  %1551 = vmatprep.mubr.msk.f32.mxu1 %vm318_vm0, %v293_v6  ;;  %v693_v24 = vrot.slane %v1849_v23, %v1834_v16  ;;  %v679_v26 = vrot.slane %v1849_v23, %v1843_v21  ;;  %v283_v29 = vld [vmem:[%s1804_s29 + $0x40] sm:$0xff]  ;;  %v301_v30 = vld [vmem:[%s1804_s29 + $0xd0] sm:$0xff]  ;;  %v686_v33 = vrot.slane %v1849_v23, %v1846_v22  ;;  %v284_v34 = vld [vmem:[%s1804_s29 + $0x48] sm:$0xff] }
  0x1d   : > { %1525 = vmatmul.mubr.msk.f32.vlgmr.msra.gmra.mxu0 %vm318_vm0, %v276_v7  ;;  %1552 = vmatmul.mubr.msk.f32.vlgmr.msra.gmra.mxu1 %vm318_vm0, %v294_v8  ;;  %v302_v35 = vld [vmem:[%s1804_s29 + $0xd8] sm:$0xff]  ;;  %v285_v36 = vld [vmem:[%s1804_s29 + $0x50] sm:$0xff]  ;;  %v303_v37 = vld [vmem:[%s1804_s29 + $0xe0] sm:$0xff]  ;;  %v700_v38 = vrot.slane %v1849_v23, %v1869_v32  ;;  %v707_v45 = vrot.slane %v1849_v23, %v1884_v39  ;;  %v714_v51 = vrot.slane %v1849_v23, %v1899_v46 }
  0x1e   : > { %1527 = vmatprep.mubr.msk.f32.mxu0 %vm318_vm0, %v277_v9  ;;  %1554 = vmatprep.mubr.msk.f32.mxu1 %vm318_vm0, %v295_v10  ;;  %v286_v41 = vld [vmem:[%s1804_s29 + $0x58] sm:$0xff]  ;;  %v304_v42 = vld [vmem:[%s1804_s29 + $0xe8] sm:$0xff]  ;;  %v287_v43 = vld [vmem:[%s1804_s29 + $0x60] sm:$0xff]  ;;  %v756_v52 = vrot.slane %v1856_v25, %v1869_v32  ;;  %v763_v58 = vrot.slane %v1856_v25, %v1884_v39  ;;  %v721_v60 = vrot.slane %v1849_v23, %v720_v57 }
  0x1f   : > { %695 = vbcast.lane.b32.xlu1 %v693_v24, 256  ;;  %681 = vbcast.lane.b32.xlu0 %v679_v26, 256  ;;  %v305_v44 = vld [vmem:[%s1804_s29 + $0xf0] sm:$0xff]  ;;  %v288_v48 = vld [vmem:[%s1804_s29 + $0x68] sm:$0xff]  ;;  %v306_v49 = vld [vmem:[%s1804_s29 + $0xf8] sm:$0xff]  ;;  %v770_v63 = vrot.slane %v1856_v25, %v1899_v46  ;;  %v777_v4 = vrot.slane %v1856_v25, %v720_v57  ;;  %v728_v5 = vrot.slane %v1849_v23, %v727_v3 }
  0x20   : > { %v289_v50 = vld [vmem:[%s1804_s29 + $0x70] sm:$0xff]  ;;  %v290_v54 = vld [vmem:[%s1804_s29 + $0x78] sm:$0xff]  ;;  %v291_v55 = vld [vmem:[%s1804_s29 + $0x80] sm:$0xff]  ;;  %v784_v9 = vrot.slane %v1856_v25, %v727_v3 }
  0x21   : > { %1528 = vmatmul.mubr.msk.f32.gmra.mxu0 %vm318_vm0, %v278_v12  ;;  %1555 = vmatmul.mubr.msk.f32.gmra.mxu1 %vm318_vm0, %v296_v13  ;;  %v674_v53 = vld [vmem:[%s1831_s12 + $0x10] sm:$0xff]  ;;  %v292_v59 = vld [vmem:[%s1804_s29 + $0x88] sm:$0xff]  ;;  %v675_v0 = vld [vmem:[%s1831_s12 + $0x18] sm:$0xff]  ;;  %s259_s29 = sand.u32 1, %s1687_s22  }
  0x22   : > { %1530 = vmatprep.mubr.msk.f32.mxu0 %vm318_vm0, %v279_v14  ;;  %1557 = vmatprep.mubr.msk.f32.mxu1 %vm318_vm0, %v297_v15  ;;  %v791_v56 = vrot.slane %v674_v53, %v1843_v21  ;;  %v798_v61 = vrot.slane %v674_v53, %v1846_v22  ;;  %v805_v62 = vrot.slane %v674_v53, %v1834_v16  ;;  %v1157_v25 = vld [vmem:[%s2242_s4 + $0x8] sm:$0xff]  ;;  %v1156_v26 = vld [vmem:[%s2242_s4] sm:$0xff]  ;;  %s1423_s9 = sshll.u32 %s259_s29, 5  ;;  %s2198_s18 = scalar_lea.sflag [#allocation3], %s259_s29 }
  0x23   : > { %737 = vbcast.lane.b32.xlu1 %v735_v31, 256  ;;  %688 = vbcast.lane.b32.xlu0 %v686_v33, 256  ;;  %v854_v1 = vrot.slane %v675_v0, %v1846_v22  ;;  %v847_v2 = vrot.slane %v675_v0, %v1843_v21  ;;  %v861_v6 = vrot.slane %v675_v0, %v1834_v16  ;;  %v1158_v22 = vld [vmem:[%s2242_s4 + $0x10] sm:$0xff]  ;;  %s261_s12 = scalar_lea.vmem [#allocation2], %s1423_s9 }
  0x24   : > { %v812_v7 = vrot.slane %v674_v53, %v1869_v32  ;;  %v819_v8 = vrot.slane %v674_v53, %v1884_v39  ;;  %v826_v10 = vrot.slane %v674_v53, %v1899_v46  ;;  %v868_v11 = vrot.slane %v675_v0, %v1869_v32  ;;  %s1345_s13 = sshll.u32 %s261_s12, 4  ;;  %s2191_s13 = int_to_ptr.vmem [resolvable:$true] %s1345_s13 }
  0x25   : > { %1531 = vmatmul.mubr.msk.f32.gmra.mxu0 %vm318_vm0, %v280_v17  ;;  %1558 = vmatmul.mubr.msk.f32.gmra.mxu1 %vm318_vm0, %v298_v18  ;;  %v833_v12 = vrot.slane %v674_v53, %v720_v57  ;;  %v875_v13 = vrot.slane %v675_v0, %v1884_v39  ;;  %v840_v14 = vrot.slane %v674_v53, %v727_v3  ;;  %v1986_v39 = vld [vmem:[%s2241_s3] ss:$0 sm:$0xff]  ;;  %s1635_s19 = scalar_lea.vmem %s2191_s13, 512  ;;  %p1642_p1 = scmp.lt.s32.totalorder %s2191_s13, %s1640_s20 }
  0x26   : > { %1533 = vmatprep.mubr.msk.f32.mxu0 %vm318_vm0, %v281_v19  ;;  %1560 = vmatprep.mubr.msk.f32.mxu1 %vm318_vm0, %v299_v20  ;;  %v882_v15 = vrot.slane %v675_v0, %v1899_v46  ;;  %v889_v16 = vrot.slane %v675_v0, %v720_v57  ;;  %v896_v17 = vrot.slane %v675_v0, %v727_v3  ;;  %v1159_v19 = vld [vmem:[%s2242_s4 + $0x18] sm:$0xff]  ;;  %p1636_p12 = scmp.ne.s32.totalorder %s2191_s13, %s1635_s19  ;;  %p1643_p2 = scmp.lt.s32.totalorder %s1641_s26, %s1635_s19 }
  0x27   : > { %702 = vbcast.lane.b32.xlu1 %v700_v38, 256  ;;  %744 = vbcast.lane.b32.xlu0 %v742_v40, 256 }
  0x28   : > { %1572 = vmatprep.subr.mxu1 %v1159_v19  ;;  %p1637_p13 = pnand %p1636_p12, %p1773_p5  ;;  %p1644_p3 = por %p1643_p2, %p1642_p1 }
  0x29   : > { %1534 = vmatmul.mubr.msk.f32.gmra.mxu0 %vm318_vm0, %v282_v27  ;;  %1561 = vmatmul.mubr.msk.f32.gmra.mxu1 %vm318_vm0, %v300_v28 }
  0x2a   : > { %1536 = vmatprep.mubr.msk.f32.mxu0 %vm318_vm0, %v283_v29  ;;  %1563 = vmatprep.mubr.msk.f32.mxu1 %vm318_vm0, %v301_v30  ;;  %p1638_p0 = pneg %p1637_p13 }
  0x2b   : > { %709 = vbcast.lane.b32.xlu1 %v707_v45, 256  ;;  %751 = vbcast.lane.b32.xlu0 %v749_v47, 256 }
  0x2c   : > { %1573 = vmatpush3.msra.mxu1 %v1159_v19  ;;  %p1645_p4 = pnand %p1644_p3, %p1638_p0 }
  0x2d   : > { %1537 = vmatmul.mubr.msk.f32.gmra.mxu0 %vm318_vm0, %v284_v34  ;;  %1564 = vmatmul.mubr.msk.f32.gmra.mxu1 %vm318_vm0, %v302_v35 }
  0x2e   : > { %1539 = vmatprep.mubr.msk.f32.mxu0 %vm318_vm0, %v285_v36  ;;  %1566 = vmatprep.mubr.msk.f32.mxu1 %vm318_vm0, %v303_v37 }
  0x2f   : > { %716 = vbcast.lane.b32.xlu1 %v714_v51, 256  ;;  %758 = vbcast.lane.b32.xlu0 %v756_v52, 256 }
  0x30   : > { %1574 = vmatprep.subr.mxu1 %v1158_v22 }
  0x31   : > { %1540 = vmatmul.mubr.msk.f32.gmra.mxu0 %vm318_vm0, %v286_v41  ;;  %1567 = vmatmul.mubr.msk.f32.gmra.mxu1 %vm318_vm0, %v304_v42 }
  0x32   : > { %1542 = vmatprep.mubr.msk.f32.mxu0 %vm318_vm0, %v287_v43  ;;  %1569 = vmatprep.mubr.msk.f32.mxu1 %vm318_vm0, %v305_v44 }
  0x33   : > { %793 = vbcast.lane.b32.xlu1 %v791_v56, 256  ;;  %765 = vbcast.lane.b32.xlu0 %v763_v58, 256 }
  0x34   : > { %1575 = vmatpush3.msra.mxu1 %v1158_v22 }
  0x35   : > { %1543 = vmatmul.mubr.msk.f32.gmra.mxu0 %vm318_vm0, %v288_v48  ;;  %1570 = vmatmul.mubr.msk.f32.gmra.mxu1 %vm318_vm0, %v306_v49 }
  0x36   : > { %1545 = vmatprep.mubr.msk.f32.mxu0 %vm318_vm0, %v289_v50  ;;  %1576 = vmatprep.subr.mxu1 %v1157_v25 }
  0x37   : > { %723 = vbcast.lane.b32.xlu1 %v721_v60, 256  ;;  %800 = vbcast.lane.b32.xlu0 %v798_v61, 256 }
  0x38   : > { %1577 = vmatpush3.msra.mxu1 %v1157_v25 }
  0x39   : > { %1546 = vmatmul.mubr.msk.f32.gmra.mxu0 %vm318_vm0, %v290_v54  ;;  %1578 = vmatprep.subr.mxu1 %v1156_v26 }
  0x3a   : > { %1548 = vmatprep.mubr.msk.f32.mxu0 %vm318_vm0, %v291_v55  ;;  %1579 = vmatpush3.msra.mxu1 %v1156_v26 }
  0x3b   : > { %807 = vbcast.lane.b32.xlu1 %v805_v62, 256  ;;  %772 = vbcast.lane.b32.xlu0 %v770_v63, 256 }
  0x3d   : > { %1549 = vmatmul.mubr.msk.f32.gmra.mxu0 %vm318_vm0, %v292_v59 }
  0x3f   : > { %856 = vbcast.lane.b32.xlu1 %v854_v1, 256  ;;  %849 = vbcast.lane.b32.xlu0 %v847_v2, 256 }
  0x43   : > { %779 = vbcast.lane.b32.xlu1 %v777_v4, 256  ;;  %730 = vbcast.lane.b32.xlu0 %v728_v5, 256 }
  0x47   : > { %863 = vbcast.lane.b32.xlu1 %v861_v6, 256  ;;  %814 = vbcast.lane.b32.xlu0 %v812_v7, 256 }
  0x4b   : > { %821 = vbcast.lane.b32.xlu1 %v819_v8, 256  ;;  %786 = vbcast.lane.b32.xlu0 %v784_v9, 256 }
  0x4f   : > { %828 = vbcast.lane.b32.xlu1 %v826_v10, 256  ;;  %870 = vbcast.lane.b32.xlu0 %v868_v11, 256 }
  0x53   : > { %835 = vbcast.lane.b32.xlu1 %v833_v12, 256  ;;  %877 = vbcast.lane.b32.xlu0 %v875_v13, 256 }
  0x57   : > { %842 = vbcast.lane.b32.xlu1 %v840_v14, 256  ;;  %884 = vbcast.lane.b32.xlu0 %v882_v15, 256 }
  0x5b   : > { %891 = vbcast.lane.b32.xlu0 %v889_v16, 256  ;;  %898 = vbcast.lane.b32.xlu1 %v896_v17, 256 }
  0x91   : > { %v1947_v18 = vpop.permute.xlu1 %695  ;;  %v682_v21 = vpop.permute.xlu0 %681 }
  0x95   : > { %v1952_v20 = vpop.permute.xlu1 %737  ;;  %v689_v24 = vpop.permute.xlu0 %688 }
  0x99   : > { %v703_v23 = vpop.permute.xlu1 %702  ;;  %v1965_v28 = vpop.permute.xlu0 %744 }
  0x9d   : > { %v1963_v27 = vpop.permute.xlu1 %709  ;;  %v1967_v30 = vpop.permute.xlu0 %751 }
  0xa1   : > { %v717_v29 = vpop.permute.xlu1 %716  ;;  %v1971_v32 = vpop.permute.xlu0 %758 }
  0xa5   : > { %v1969_v31 = vpop.permute.xlu1 %793  ;;  %v1975_v34 = vpop.permute.xlu0 %765 }
  0xa9   : > { %v1973_v33 = vpop.permute.xlu1 %723  ;;  %v1977_v36 = vpop.permute.xlu0 %800 }
  0xad   : > { %v808_v35 = vpop.permute.xlu1 %807  ;;  %v1981_v38 = vpop.permute.xlu0 %772 }
  0xb1   : > { %v1979_v37 = vpop.permute.xlu1 %856  ;;  %v1991_v47 = vpop.permute.xlu0 %849 }
  0xb5   : > { %v1989_v45 = vpop.permute.xlu1 %779  ;;  %v2004_v7 = vpop.permute.xlu0 %730 }
  0xb9   : > { %v2002_v6 = vpop.permute.xlu1 %863 }
  0xbd   : > { %v822_v26 = vpop.permute.xlu1 %821 }
  0xdd   : > { %v1526_v40 = vpop.f32.mrf.mxu0  ;;  %v1553_v41 = vpop.f32.mrf.mxu1 }
  0xde   : > { %v487_v42 = vadd.f32 %v1526_v40, %v1986_v39  ;;  %v577_v62 = vadd.f32 %v1553_v41, %v1986_v39 }
  0xdf   : > { %v481_v43 = vpop.f32.mrf.mxu0  ;;  %v571_v44 = vpop.f32.mrf.mxu1 }
  0xe0   : > { %v641_v46 = vmax.f32 %v487_v42, 0.0  ;;  %v482_v48 = vadd.f32 %v1986_v39, %v481_v43  ;;  %v572_v49 = vadd.f32 %v1986_v39, %v571_v44  ;;  %v659_v13 = vmax.f32 %v577_v62, 0.0 }
  0xe1   : > { %v1529_v50 = vpop.f32.mrf.mxu0  ;;  %v1556_v51 = vpop.f32.mrf.mxu1 }
  0xe2   : > { %v901_v52 = vmul.f32 %v689_v24, %v641_v46  ;;  %v640_v53 = vmax.f32 %v482_v48, 0.0  ;;  %v658_v54 = vmax.f32 %v572_v49, 0.0  ;;  %v497_v55 = vadd.f32 %v1529_v50, %v1986_v39 }
  0xe3   : > { %v491_v56 = vpop.f32.mrf.mxu0  ;;  %v581_v0 = vpop.f32.mrf.mxu1 }
  0xe4   : > { %v939_v57 = vsel %vm318_vm0, %v901_v52, 0.0  ;;  %v900_v58 = vmul.f32 %v682_v21, %v640_v53  ;;  %v918_v59 = vmul.f32 %v808_v35, %v658_v54  ;;  %v643_v60 = vmax.f32 %v497_v55, 0.0  ;;  %v815_v35 = vpop.permute.xlu0 %814 }
  0xe5   : > { %v940_v61 = vrot.slane %v939_v57, 4  ;;  %v492_v63 = vadd.f32 %v1986_v39, %v491_v56  ;;  %v1532_v1 = vpop.f32.mrf.mxu0  ;;  %v582_v4 = vadd.f32 %v1986_v39, %v581_v0  ;;  %v1559_v19 = vpop.f32.mrf.mxu1  ;;  %v919_v41 = vmul.f32 %v815_v35, %v659_v13 }
  0xe6   : > { %v932_v2 = vsel %vm318_vm0, %v900_v58, 0.0  ;;  %v903_v3 = vmul.f32 %v703_v23, %v643_v60  ;;  %v507_v5 = vadd.f32 %v1532_v1, %v1986_v39  ;;  %v1058_v11 = vsel %vm318_vm0, %v918_v59, 0.0 }
  0xe7   : > { %v642_v8 = vmax.f32 %v492_v63, 0.0  ;;  %v941_v9 = vadd.f32 %v940_v61, %v939_v57  ;;  %v933_v10 = vrot.slane %v932_v2, 4  ;;  %v660_v16 = vmax.f32 %v582_v4, 0.0  ;;  %v501_v42 = vpop.f32.mrf.mxu0  ;;  %v591_v44 = vpop.f32.mrf.mxu1 }
  0xe8   : > { %v645_v12 = vmax.f32 %v507_v5, 0.0  ;;  %v953_v14 = vsel %vm318_vm0, %v903_v3, 0.0  ;;  %v1059_v17 = vrot.slane %v1058_v11, 4  ;;  %v502_v52 = vadd.f32 %v1986_v39, %v501_v42 }
  0xe9   : > { %v902_v15 = vmul.f32 %v1947_v18, %v642_v8  ;;  %v942_v21 = vrot.slane %v941_v9, 2  ;;  %v934_v22 = vadd.f32 %v933_v10, %v932_v2  ;;  %v954_v24 = vrot.slane %v953_v14, 4  ;;  %v1535_v55 = vpop.f32.mrf.mxu0  ;;  %v1562_v59 = vpop.f32.mrf.mxu1 }
  0xea   : > { %v905_v23 = vmul.f32 %v717_v29, %v645_v12  ;;  %v920_v40 = vmul.f32 %v822_v26, %v660_v16  ;;  %v1060_v43 = vadd.f32 %v1059_v17, %v1058_v11  ;;  %v587_v29 = vadd.f32 %v1556_v51, %v1986_v39  ;;  %v829_v8 = vpop.permute.xlu1 %828 }
  0xeb   : > { %v946_v25 = vsel %vm318_vm0, %v902_v15, 0.0  ;;  %v943_v46 = vadd.f32 %v942_v21, %v941_v9  ;;  %v935_v48 = vrot.slane %v934_v22, 2  ;;  %v955_v50 = vadd.f32 %v954_v24, %v953_v14  ;;  %v511_v13 = vpop.f32.mrf.mxu0  ;;  %v601_v14 = vpop.f32.mrf.mxu1 }
  0xec   : > { %v947_v49 = vrot.slane %v946_v25, 4  ;;  %v967_v18 = vsel %vm318_vm0, %v905_v23, 0.0  ;;  %v1072_v53 = vsel %vm318_vm0, %v920_v40, 0.0  ;;  %v1065_v54 = vsel %vm318_vm0, %v919_v41, 0.0 }
  0xed   : > { %v1061_v56 = vrot.slane %v1060_v43, 2  ;;  %v968_v57 = vrot.slane %v967_v18, 4  ;;  %v644_v58 = vmax.f32 %v502_v52, 0.0  ;;  %v944_v60 = vrot.slane %v943_v46, 1 }
  0xee   : > { %v936_v61 = vadd.f32 %v935_v48, %v934_v22  ;;  %v948_v62 = vadd.f32 %v947_v49, %v946_v25  ;;  %v2016_v63 = vadd.f32 %v1559_v19, %v1986_v39  ;;  %v956_v0 = vrot.slane %v955_v50, 2 }
  0xef   : > { %v1073_v1 = vrot.slane %v1072_v53, 4  ;;  %v1066_v2 = vrot.slane %v1065_v54, 4  ;;  %v517_v51 = vadd.f32 %v1535_v55, %v1986_v39  ;;  %v661_v3 = vmax.f32 %v587_v29, 0.0 }
  0xf0   : > { %v904_v4 = vmul.f32 %v1963_v27, %v644_v58  ;;  %v592_v5 = vadd.f32 %v1986_v39, %v591_v44  ;;  %v2021_v9 = vadd.f32 %v1061_v56, %v1060_v43  ;;  %v969_v10 = vadd.f32 %v968_v57, %v967_v18  ;;  %v1538_v18 = vpop.f32.mrf.mxu0 }
  0xf1   : > { %v647_v11 = vmax.f32 %v517_v51, 0.0  ;;  %v607_v12 = vadd.f32 %v1562_v59, %v1986_v39  ;;  %v945_v15 = vadd.f32 %v944_v60, %v943_v46  ;;  %v937_v16 = vrot.slane %v936_v61, 1 }
  0xf2   : > { %v949_v17 = vrot.slane %v948_v62, 2  ;;  %v663_v19 = vmax.f32 %v2016_v63, 0.0  ;;  %v957_v21 = vadd.f32 %v956_v0, %v955_v50  ;;  %v1074_v22 = vadd.f32 %v1073_v1, %v1072_v53 }
  0xf3   : > { %v1067_v23 = vadd.f32 %v1066_v2, %v1065_v54  ;;  %v665_v27 = vmax.f32 %v607_v12, 0.0  ;;  %v960_v24 = vsel %vm318_vm0, %v904_v4, 0.0  ;;  %v662_v25 = vmax.f32 %v592_v5, 0.0  ;;  %v836_v54 = vpop.permute.xlu1 %835  ;;  %v2044_v4 = vpop.permute.xlu0 %786 }
  0xf4   : > { %v512_v26 = vadd.f32 %v1986_v39, %v511_v13  ;;  %v602_v35 = vadd.f32 %v1986_v39, %v601_v14  ;;  %v1063_v40 = vrot.slane %v2021_v9, 1  ;;  %v970_v41 = vrot.slane %v969_v10, 2  ;;  %v521_v12 = vpop.f32.mrf.mxu0 }
  0xf5   : > { %v907_v42 = vmul.f32 %v2004_v7, %v647_v11  ;;  %v925_v43 = vmul.f32 %v1979_v37, %v665_v27  ;;  %v938_v44 = vadd.f32 %v937_v16, %v936_v61  ;;  %v950_v46 = vadd.f32 %v949_v17, %v948_v62  ;;  %v1565_v7 = vpop.f32.mrf.mxu1 }
  0xf6   : > { %v646_v48 = vmax.f32 %v512_v26, 0.0  ;;  %v664_v49 = vmax.f32 %v602_v35, 0.0  ;;  %v958_v50 = vrot.slane %v957_v21, 1  ;;  %v1075_v52 = vrot.slane %v1074_v22, 2 }
  0xf7   : > { %v961_v29 = vrot.slane %v960_v24, 4  ;;  %v921_v53 = vmul.f32 %v829_v8, %v661_v3  ;;  %v1068_v55 = vrot.slane %v1067_v23, 2  ;;  %v922_v58 = vmul.f32 %v836_v54, %v662_v25  ;;  %v611_v13 = vpop.f32.mrf.mxu1 }
  0xf8   : > { %v906_v56 = vmul.f32 %v1973_v33, %v646_v48  ;;  %v924_v57 = vmul.f32 %v1991_v47, %v664_v49  ;;  %v971_v59 = vadd.f32 %v970_v41, %v969_v10  ;;  %v981_v37 = vsel %vm318_vm0, %v907_v42, 0.0 }
  0xf9   : > { %v1107_v60 = vsel %vm318_vm0, %v925_v43, 0.0  ;;  %v527_v61 = vadd.f32 %v1538_v18, %v1986_v39  ;;  %v1200_v62 = vsel %vm1199_vm1, %v945_v15, %v938_v44  ;;  %v951_v0 = vrot.slane %v950_v46, 1 }
  0xfa   : > { %v974_v1 = vsel %vm318_vm0, %v906_v56, 0.0  ;;  %v1100_v2 = vsel %vm318_vm0, %v924_v57, 0.0  ;;  %v2039_v51 = vadd.f32 %v958_v50, %v957_v21  ;;  %v2041_v33 = vadd.f32 %v1075_v52, %v1074_v22  ;;  %v1541_v52 = vpop.f32.mrf.mxu0 }
  0xfb   : > { %v962_v47 = vadd.f32 %v961_v29, %v960_v24  ;;  %v1079_v3 = vsel %vm318_vm0, %v921_v53, 0.0  ;;  %v982_v5 = vrot.slane %v981_v37, 4  ;;  %v1108_v8 = vrot.slane %v1107_v60, 4 }
  0xfc   : > { %v1086_v10 = vsel %vm318_vm0, %v922_v58, 0.0  ;;  %v649_v11 = vmax.f32 %v527_v61, 0.0  ;;  %v972_v14 = vrot.slane %v971_v59, 1  ;;  %v2047_v15 = vadd.f32 %v1068_v55, %v1067_v23 }
  0xfd   : > { %v975_v16 = vrot.slane %v974_v1, 4  ;;  %v1101_v17 = vrot.slane %v1100_v2, 4  ;;  %v952_v21 = vadd.f32 %v951_v0, %v950_v46  ;;  %v1080_v22 = vrot.slane %v1079_v3, 4  ;;  %v871_v46 = vpop.permute.xlu0 %870 }
  0xfe   : > { %v909_v27 = vmul.f32 %v1965_v28, %v649_v11  ;;  %v617_v24 = vadd.f32 %v1565_v7, %v1986_v39  ;;  %v963_v25 = vrot.slane %v962_v47, 2  ;;  %v1087_v26 = vrot.slane %v1086_v10, 4  ;;  %v843_v7 = vpop.permute.xlu1 %842 }
  0xff   : > { %v522_v35 = vadd.f32 %v1986_v39, %v521_v12  ;;  %v612_v41 = vadd.f32 %v1986_v39, %v611_v13  ;;  %v983_v42 = vadd.f32 %v982_v5, %v981_v37  ;;  %v1109_v43 = vadd.f32 %v1108_v8, %v1107_v60  ;;  %v1568_v5 = vpop.f32.mrf.mxu1 }
 0x100   : > { %v995_v44 = vsel %vm318_vm0, %v909_v27, 0.0  ;;  %v667_v23 = vmax.f32 %v617_v24, 0.0  ;;  %v976_v48 = vadd.f32 %v975_v16, %v974_v1  ;;  %v1102_v49 = vadd.f32 %v1101_v17, %v1100_v2 }
 0x101   : > { %v996_v18 = vrot.slane %v995_v44, 4  ;;  %v648_v50 = vmax.f32 %v522_v35, 0.0  ;;  %v2055_v28 = vsel %vm1201_vm2, %v952_v21, %v1200_v62  ;;  %v2057_v29 = vadd.f32 %v972_v14, %v971_v59  ;;  %v621_v63 = vpop.f32.mrf.mxu1 }
 0x102   : > { %v927_v53 = vmul.f32 %v871_v46, %v667_v23  ;;  %v666_v54 = vmax.f32 %v612_v41, 0.0  ;;  %v964_v55 = vadd.f32 %v963_v25, %v962_v47  ;;  %v2059_v56 = vadd.f32 %v1080_v22, %v1079_v3  ;;  %v531_v47 = vpop.f32.mrf.mxu0 }
 0x103   : > { %v997_v57 = vadd.f32 %v996_v18, %v995_v44  ;;  %v908_v58 = vmul.f32 %v1952_v20, %v648_v50  ;;  %v984_v37 = vrot.slane %v983_v42, 2  ;;  %v2062_v60 = vadd.f32 %v1087_v26, %v1086_v10 }
 0x104   : > { %v926_v61 = vmul.f32 %v2002_v6, %v666_v54  ;;  %v537_v0 = vadd.f32 %v1541_v52, %v1986_v39  ;;  %v1110_v62 = vrot.slane %v1109_v43, 2  ;;  %v977_v1 = vrot.slane %v976_v48, 2 }
 0x105   : > { %v1103_v59 = vrot.slane %v1102_v49, 2  ;;  %v1121_v2 = vsel %vm318_vm0, %v927_v53, 0.0  ;;  %v988_v3 = vsel %vm318_vm0, %v908_v58, 0.0  ;;  %v923_v20 = vmul.f32 %v843_v7, %v663_v19  ;;  %v1544_v19 = vpop.f32.mrf.mxu0 }
 0x106   : > { %v1114_v8 = vsel %vm318_vm0, %v926_v61, 0.0  ;;  %v651_v10 = vmax.f32 %v537_v0, 0.0  ;;  %v965_v11 = vrot.slane %v964_v55, 1  ;;  %v1082_v6 = vrot.slane %v2059_v56, 2 }
 0x107   : > { %v998_v12 = vrot.slane %v997_v57, 2  ;;  %v989_v13 = vrot.slane %v988_v3, 4  ;;  %v2072_v14 = vadd.f32 %v984_v37, %v983_v42  ;;  %v1122_v16 = vrot.slane %v1121_v2, 4  ;;  %v541_v7 = vpop.f32.mrf.mxu0 }
 0x108   : > { %v1115_v17 = vrot.slane %v1114_v8, 4  ;;  %v911_v21 = vmul.f32 %v1971_v32, %v651_v10  ;;  %v1111_v22 = vadd.f32 %v1110_v62, %v1109_v43  ;;  %v1089_v27 = vrot.slane %v2062_v60, 2  ;;  %v878_v32 = vpop.permute.xlu0 %877 }
 0x109   : > { %v990_v24 = vadd.f32 %v989_v13, %v988_v3  ;;  %v532_v25 = vadd.f32 %v1986_v39, %v531_v47  ;;  %v978_v26 = vadd.f32 %v977_v1, %v976_v48  ;;  %v1104_v35 = vadd.f32 %v1103_v59, %v1102_v49 }
 0x10a   : > { %v1093_v41 = vsel %vm318_vm0, %v923_v20, 0.0  ;;  %v1009_v44 = vsel %vm318_vm0, %v911_v21, 0.0  ;;  %v2079_v42 = vadd.f32 %v965_v11, %v964_v55  ;;  %v999_v23 = vadd.f32 %v998_v12, %v997_v57 }
 0x10b   : > { %v1116_v18 = vadd.f32 %v1115_v17, %v1114_v8  ;;  %v1010_v46 = vrot.slane %v1009_v44, 4  ;;  %v1123_v43 = vadd.f32 %v1122_v16, %v1121_v2  ;;  %v627_v50 = vadd.f32 %v1568_v5, %v1986_v39  ;;  %v1571_v2 = vpop.f32.mrf.mxu1  ;;  %v1547_v16 = vpop.f32.mrf.mxu0 }
 0x10c   : > { %v650_v52 = vmax.f32 %v532_v25, 0.0  ;;  %v622_v53 = vadd.f32 %v1986_v39, %v621_v63  ;;  %v1112_v54 = vrot.slane %v1111_v22, 1  ;;  %v991_v58 = vrot.slane %v990_v24, 2  ;;  %v885_v13 = vpop.permute.xlu0 %884 }
 0x10d   : > { %v1094_v48 = vrot.slane %v1093_v41, 4  ;;  %v547_v49 = vadd.f32 %v1544_v19, %v1986_v39  ;;  %v979_v37 = vrot.slane %v978_v26, 1  ;;  %v1105_v61 = vrot.slane %v1104_v35, 1 }
 0x10e   : > { %v910_v55 = vmul.f32 %v1967_v30, %v650_v52  ;;  %v668_v57 = vmax.f32 %v622_v53, 0.0  ;;  %v1000_v0 = vrot.slane %v999_v23, 1  ;;  %v1117_v62 = vrot.slane %v1116_v18, 2 }
 0x10f   : > { %v1011_v1 = vadd.f32 %v1010_v46, %v1009_v44  ;;  %v653_v59 = vmax.f32 %v547_v49, 0.0  ;;  %v1124_v5 = vrot.slane %v1123_v43, 2  ;;  %v669_v47 = vmax.f32 %v627_v50, 0.0 }
 0x110   : > { %v1002_v3 = vsel %vm318_vm0, %v910_v55, 0.0  ;;  %v928_v8 = vmul.f32 %v878_v32, %v668_v57  ;;  %v992_v20 = vadd.f32 %v991_v58, %v990_v24  ;;  %v2086_v10 = vadd.f32 %v1094_v48, %v1093_v41  ;;  %v631_v24 = vpop.f32.mrf.mxu1 }
 0x111   : > { %v1003_v11 = vrot.slane %v1002_v3, 4  ;;  %v913_v12 = vmul.f32 %v1981_v38, %v653_v59  ;;  %v2089_v30 = vadd.f32 %v1112_v54, %v1111_v22  ;;  %v2091_v17 = vadd.f32 %v979_v37, %v978_v26 }
 0x112   : > { %v2093_v21 = vadd.f32 %v1105_v61, %v1104_v35  ;;  %v1128_v25 = vsel %vm318_vm0, %v928_v8, 0.0  ;;  %v1118_v63 = vadd.f32 %v1117_v62, %v1116_v18  ;;  %v1012_v19 = vrot.slane %v1011_v1, 2  ;;  %v551_v35 = vpop.f32.mrf.mxu0  ;;  %v892_v61 = vpop.permute.xlu0 %891 }
 0x113   : > { %v1004_v44 = vadd.f32 %v1003_v11, %v1002_v3  ;;  %v1129_v46 = vrot.slane %v1128_v25, 4  ;;  %v1001_v41 = vadd.f32 %v1000_v0, %v999_v23  ;;  %v2096_v32 = vadd.f32 %v1124_v5, %v1123_v43 }
 0x114   : > { %v1023_v38 = vsel %vm318_vm0, %v913_v12, 0.0  ;;  %v929_v50 = vmul.f32 %v885_v13, %v669_v47  ;;  %v993_v52 = vrot.slane %v992_v20, 1  ;;  %v1096_v22 = vrot.slane %v2086_v10, 2 }
 0x115   : > { %v1005_v26 = vrot.slane %v1004_v44, 2  ;;  %v1024_v53 = vrot.slane %v1023_v38, 4  ;;  %v542_v18 = vadd.f32 %v1986_v39, %v541_v7  ;;  %v632_v58 = vadd.f32 %v1986_v39, %v631_v24  ;;  %v899_v24 = vpop.permute.xlu1 %898 }
 0x116   : > { %v1135_v54 = vsel %vm318_vm0, %v929_v50, 0.0  ;;  %v557_v48 = vadd.f32 %v1547_v16, %v1986_v39  ;;  %v1119_v23 = vrot.slane %v1118_v63, 1  ;;  %v1013_v43 = vadd.f32 %v1012_v19, %v1011_v1  ;;  %v1550_v1 = vpop.f32.mrf.mxu0 }
 0x117   : > { %v1130_v49 = vadd.f32 %v1129_v46, %v1128_v25  ;;  %v637_v37 = vadd.f32 %v1571_v2, %v1986_v39  ;;  %v652_v55 = vmax.f32 %v542_v18, 0.0  ;;  %v670_v57 = vmax.f32 %v632_v58, 0.0 }
 0x118   : > { %v655_v0 = vmax.f32 %v557_v48, 0.0  ;;  %v552_v62 = vadd.f32 %v1986_v39, %v551_v35  ;;  %v994_v59 = vadd.f32 %v993_v52, %v992_v20  ;;  %v1006_v5 = vadd.f32 %v1005_v26, %v1004_v44  ;;  %v561_v18 = vpop.f32.mrf.mxu0 }
 0x119   : > { %v1025_v47 = vadd.f32 %v1024_v53, %v1023_v38  ;;  %v1136_v3 = vrot.slane %v1135_v54, 4  ;;  %v912_v7 = vmul.f32 %v1975_v34, %v652_v55  ;;  %v930_v11 = vmul.f32 %v892_v61, %v670_v57 }
 0x11a   : > { %v915_v8 = vmul.f32 %v2044_v4, %v655_v0  ;;  %v654_v12 = vmax.f32 %v552_v62, 0.0  ;;  %v1126_v13 = vrot.slane %v2096_v32, 1  ;;  %v1014_v2 = vrot.slane %v1013_v43, 1 }
 0x11b   : > { %v1131_v16 = vrot.slane %v1130_v49, 2  ;;  %v671_v25 = vmax.f32 %v637_v37, 0.0  ;;  %v1016_v19 = vsel %vm318_vm0, %v912_v7, 0.0  ;;  %v1142_v20 = vsel %vm318_vm0, %v930_v11, 0.0 }
 0x11c   : > { %v1037_v46 = vsel %vm318_vm0, %v915_v8, 0.0  ;;  %v914_v44 = vmul.f32 %v1989_v45, %v654_v12  ;;  %v1213_v34 = vsel %vm1199_vm1, %v1001_v41, %v994_v59  ;;  %v2114_v4 = vadd.f32 %v1119_v23, %v1118_v63 }
 0x11d   : > { %v1007_v38 = vrot.slane %v1006_v5, 1  ;;  %v1026_v50 = vrot.slane %v1025_v47, 2  ;;  %v1137_v52 = vadd.f32 %v1136_v3, %v1135_v54  ;;  %v1017_v26 = vrot.slane %v1016_v19, 4 }
 0x11e   : > { %v1038_v53 = vrot.slane %v1037_v46, 4  ;;  %v1030_v35 = vsel %vm318_vm0, %v914_v44, 0.0  ;;  %v1015_v58 = vadd.f32 %v1014_v2, %v1013_v43  ;;  %v1143_v48 = vrot.slane %v1142_v20, 4 }
 0x11f   : > { %v1031_v37 = vrot.slane %v1030_v35, 4  ;;  %v931_v61 = vmul.f32 %v899_v24, %v671_v25  ;;  %v2117_v45 = vadd.f32 %v1131_v16, %v1130_v49  ;;  %v1018_v41 = vadd.f32 %v1017_v26, %v1016_v19 }
 0x120   : > { %v1039_v63 = vadd.f32 %v1038_v53, %v1037_v46  ;;  %v567_v23 = vadd.f32 %v1550_v1, %v1986_v39  ;;  %v1008_v55 = vadd.f32 %v1007_v38, %v1006_v5  ;;  %v562_v0 = vadd.f32 %v1986_v39, %v561_v18 }
 0x121   : > { %v1032_v54 = vadd.f32 %v1031_v37, %v1030_v35  ;;  %v1149_v57 = vsel %vm318_vm0, %v931_v61, 0.0  ;;  %v1027_v62 = vadd.f32 %v1026_v50, %v1025_v47  ;;  %v1138_v43 = vrot.slane %v1137_v52, 2 }
 0x122   : > { %v1019_v59 = vrot.slane %v1018_v41, 2  ;;  %v1040_v3 = vrot.slane %v1039_v63, 2  ;;  %v1144_v7 = vadd.f32 %v1143_v48, %v1142_v20  ;;  %v657_v49 = vmax.f32 %v567_v23, 0.0 }
 0x123   : > { %v1033_v8 = vrot.slane %v1032_v54, 2  ;;  %v656_v11 = vmax.f32 %v562_v0, 0.0  ;;  %v1133_v12 = vrot.slane %v2117_v45, 1  ;;  %v1150_v16 = vrot.slane %v1149_v57, 4 }
 0x124   : > { %v1020_v2 = vadd.f32 %v1019_v59, %v1018_v41  ;;  %v1041_v1 = vadd.f32 %v1040_v3, %v1039_v63  ;;  %v1214_v5 = vsel %vm1201_vm2, %v1008_v55, %v1213_v34  ;;  %v917_v19 = vmul.f32 %v1977_v36, %v657_v49 }
 0x125   : > { %v1034_v25 = vadd.f32 %v1033_v8, %v1032_v54  ;;  %v916_v39 = vmul.f32 %v1969_v31, %v656_v11  ;;  %v1028_v47 = vrot.slane %v1027_v62, 1  ;;  %v1139_v46 = vadd.f32 %v1138_v43, %v1137_v52 }
 0x126   : > { %v1021_v44 = vrot.slane %v1020_v2, 1  ;;  %v986_v20 = vrot.slane %v2072_v14, 1  ;;  %v1145_v24 = vrot.slane %v1144_v7, 2  ;;  %v1051_v50 = vsel %vm318_vm0, %v917_v19, 0.0 }
 0x127   : > { %v1035_v38 = vrot.slane %v1034_v25, 1  ;;  %v1044_v26 = vsel %vm318_vm0, %v916_v39, 0.0  ;;  %v1042_v35 = vrot.slane %v1041_v1, 1  ;;  %v1151_v18 = vadd.f32 %v1150_v16, %v1149_v57 }
 0x128   : > { %v1022_v53 = vadd.f32 %v1021_v44, %v1020_v2  ;;  %v1204_v36 = vsel %vm1203_vm3, %v2039_v51, %v2055_v28  ;;  %v1052_v31 = vrot.slane %v1051_v50, 4  ;;  %v1045_v48 = vrot.slane %v1044_v26, 4 }
 0x129   : > { %v1036_v34 = vadd.f32 %v1035_v38, %v1034_v25  ;;  %v1206_v52 = vsel %vm1205_vm4, %v2079_v42, %v1204_v36  ;;  %v1029_v37 = vadd.f32 %v1028_v47, %v1027_v62  ;;  %v987_v61 = vadd.f32 %v986_v20, %v2072_v14 }
 0x12a   : > { %v1208_v41 = vsel %vm1207_vm5, %v2057_v29, %v1206_v52  ;;  %v1215_v63 = vsel %vm1203_vm3, %v1015_v58, %v1214_v5  ;;  %v1053_v23 = vadd.f32 %v1052_v31, %v1051_v50  ;;  %v1046_v55 = vadd.f32 %v1045_v48, %v1044_v26 }
 0x12b   : > { %v1210_v54 = vsel %vm1209_vm6, %v2091_v17, %v1208_v41  ;;  %v1216_v51 = vsel %vm1205_vm4, %v1022_v53, %v1215_v63  ;;  %v1043_v28 = vadd.f32 %v1042_v35, %v1041_v1  ;;  %v1152_v57 = vrot.slane %v1151_v18, 2 }
 0x12c   : > { %v1212_v0 = vsel %vm1211_vm7, %v987_v61, %v1210_v54  ;;  %v1217_v42 = vsel %vm1207_vm5, %v1029_v37, %v1216_v51  ;;  %v1146_v62 = vadd.f32 %v1145_v24, %v1144_v7  ;;  %v1054_v14 = vrot.slane %v1053_v23, 2 }
 0x12d   : > { %v1047_v43 = vrot.slane %v1046_v55, 2  ;;  %1580 = vmatprep.mubr.msk.f32.mxu1 %vm318_vm0, %v1212_v0  ;;  %v1218_v29 = vsel %vm1209_vm6, %v1036_v34, %v1217_v42  ;;  %v1070_v58 = vrot.slane %v2047_v15, 1  ;;  %v1083_v17 = vadd.f32 %v1082_v6, %v2059_v56  ;;  %v1461_v34 = vld [vmem:[%s2243_s5] ss:$0 sm:$0xff] }
 0x12e   : > { %v1090_v59 = vadd.f32 %v1089_v27, %v2062_v60  ;;  %v1219_v3 = vsel %vm1211_vm7, %v1043_v28, %v1218_v29  ;;  %v1227_v7 = vsel %vm1199_vm1, %v2089_v30, %v2093_v21  ;;  %v1097_v8 = vadd.f32 %v1096_v22, %v2086_v10 }
 0x12f   : > { %v1055_v49 = vadd.f32 %v1054_v14, %v1053_v23  ;;  %v1048_v11 = vadd.f32 %v1047_v43, %v1046_v55  ;;  %1581 = vmatmul.mubr.msk.f32.vlgmr.msra.gmra.mxu1 %vm318_vm0, %v1219_v3  ;;  %v1127_v56 = vadd.f32 %v1126_v13, %v2096_v32  ;;  %v1228_v60 = vsel %vm1201_vm2, %v2114_v4, %v1227_v7 }
 0x130   : > { %v1140_v6 = vrot.slane %v1139_v46, 1  ;;  %v1153_v27 = vadd.f32 %v1152_v57, %v1151_v18  ;;  %v1134_v2 = vadd.f32 %v1133_v12, %v2117_v45  ;;  %v1147_v30 = vrot.slane %v1146_v62, 1 }
 0x131   : > { %v1056_v21 = vrot.slane %v1055_v49, 1  ;;  %v1049_v1 = vrot.slane %v1048_v11, 1  ;;  %v1064_v10 = vadd.f32 %v1063_v40, %v2021_v9  ;;  %v1077_v22 = vrot.slane %v2041_v33, 1 }
 0x132   : > { %v1071_v16 = vadd.f32 %v1070_v58, %v2047_v15  ;;  %v1084_v5 = vrot.slane %v1083_v17, 1  ;;  %v1091_v25 = vrot.slane %v1090_v59, 1  ;;  %v1141_v4 = vadd.f32 %v1140_v6, %v1139_v46 }
 0x133   : > { %v1057_v32 = vadd.f32 %v1056_v21, %v1055_v49  ;;  %v1050_v13 = vadd.f32 %v1049_v1, %v1048_v11  ;;  %v1154_v19 = vrot.slane %v1153_v27, 1  ;;  %v1229_v39 = vsel %vm1203_vm3, %v1127_v56, %v1228_v60 }
 0x134   : > { %v1098_v45 = vrot.slane %v1097_v8, 1  ;;  %v1148_v12 = vadd.f32 %v1147_v30, %v1146_v62  ;;  %v1230_v44 = vsel %vm1205_vm4, %v1134_v2, %v1229_v39  ;;  %v1078_v9 = vadd.f32 %v1077_v22, %v2041_v33 }
 0x135   : > { %v1220_v47 = vsel %vm1199_vm1, %v1057_v32, %v1050_v13  ;;  %v1085_v15 = vadd.f32 %v1084_v5, %v1083_v17  ;;  %v1092_v24 = vadd.f32 %v1091_v25, %v1090_v59  ;;  %v1155_v38 = vadd.f32 %v1154_v19, %v1153_v27 }
 0x136   : > { %v1221_v40 = vsel %vm1201_vm2, %v1064_v10, %v1220_v47  ;;  %v1231_v50 = vsel %vm1207_vm5, %v1141_v4, %v1230_v44  ;;  %v1099_v26 = vadd.f32 %v1098_v45, %v1097_v8 }
 0x137   : > { %v1222_v20 = vsel %vm1203_vm3, %v1071_v16, %v1221_v40  ;;  %v1232_v35 = vsel %vm1209_vm6, %v1148_v12, %v1231_v50 }
 0x138   : > { %v1223_v46 = vsel %vm1205_vm4, %v1078_v9, %v1222_v20  ;;  %v1233_v36 = vsel %vm1211_vm7, %v1155_v38, %v1232_v35 }
 0x139   : > { %v1224_v53 = vsel %vm1207_vm5, %v1085_v15, %v1223_v46 }
 0x13a   : > { %v1225_v18 = vsel %vm1209_vm6, %v1092_v24, %v1224_v53 }
 0x13b   : > { %v1226_v33 = vsel %vm1211_vm7, %v1099_v26, %v1225_v18 }
 0x13c   : > { %1583 = vmatprep.mubr.msk.f32.mxu1 %vm318_vm0, %v1226_v33 }
 0x13d   : > { %1584 = vmatmul.mubr.msk.f32.gmra.mxu1 %vm318_vm0, %v1233_v36 }
 0x1ef   : > { %v1582_v31 = vpop.f32.mrf.mxu1 }
 0x1f0   : > { %v1314_v48 = vadd.f32 %v1582_v31, %v1461_v34 }
 0x1f1   : > { %v1308_v52 = vpop.f32.mrf.mxu1 }
 0x1f2   : > { %1328 = vst [vmem:[%s261_s12 + $0x8] sm:$0xff] %v1314_v48  ;;  %v1309_v37 = vadd.f32 %v1461_v34, %v1308_v52 }
 0x1f4   : > { %1327 = vst [vmem:[%s261_s12] sm:$0xff] %v1309_v37 }
 0x1fd   : > { %v1585_v61 = vpop.f32.mrf.mxu1 }
 0x1fe   : > { %v1324_v41 = vadd.f32 %v1585_v61, %v1461_v34 }
 0x1ff   : > { %v1318_v63 = vpop.f32.mrf.mxu1 }
 0x200   : > { %1330 = vst [vmem:[%s261_s12 + $0x18] sm:$0xff] %v1324_v41  ;;  %v1319_v23 = vadd.f32 %v1461_v34, %v1318_v63 }
 0x202   : > { %1329 = vst [vmem:[%s261_s12 + $0x10] sm:$0xff] %v1319_v23 }
 0x203   : > { %1648 = shalt.err (!%p1645_p4)
}
 0x204   : > { %s1649_s28 = scalar_lea.hbm %s2196_s17, 512  ;;  %s1653_s10 = scalar_lea.hbm %s2244_s6, 1024 }
 0x205   : > { %p1650_p7 = scmp.ne.s32.totalorder %s2196_s17, %s1649_s28  ;;  %p1654_p10 = scmp.lt.s32.totalorder %s2196_s17, %s2244_s6 }
 0x206   : > { %p1655_p11 = scmp.lt.s32.totalorder %s1653_s10, %s1649_s28 }
 0x207   : > { %p1651_p8 = pnand %p1650_p7, %p1773_p5 }
 0x208   : > { %p1656_p12 = por %p1655_p11, %p1654_p10 }
 0x209   : > { %p1652_p9 = pneg %p1651_p8 }
 0x20b   : > { %p1657_p13 = pnand %p1656_p12, %p1652_p9 }
 0x20d   : > { %1660 = shalt.err (!%p1657_p13)
}
 0x20e   : > { %s1698_s14 = smov 128   ;;  %s1699_s15 = smov 8  }
 0x20f   : > { %1594 = dma.vmem_to_hbm [thread:$0]  (%p1773_p5), %s2191_s13, 512, %s2196_s17, %s2198_s18, %s1698_s14, %s1698_s14, %s1699_s15  }
 0x210 PF: > { %p1600_p0 = scmp.ge.s32.totalorder %s1695_s24, 2  ;;  %s1360_s16 = sand.u32 1, %s1683_s21  }
 0x211   : > { %s1361_s19 = scalar_lea.sflag [#allocation3], %s1360_s16 }
 0x212   : > { %p1597_p1 = pnand %p1600_p0, %p1777_p6 }
 0x214   : > { %p1598_p2 = pneg %p1597_p1 }
 0x216   : > { %1678 = dma.done.wait (%p1598_p2), %s1361_s19, 512  }
 0x217   : > { %1680 = vsyncadd (%p1598_p2), %s1361_s19, 4294966784  ;;  %p16_p3 = scmp.ge.s32.totalorder %s1760_s27, 4   ;;  %s2248_s21 = smov %s1687_s22 }
 0x218   : > { %s2249_s22 = smov %s1691_s23  ;;  %s2250_s23 = smov %s1771_s30 }
 0x219   : > { %s2251_s24 = smov %s1760_s27  ;;  %18 = sbr.rel (!%p16_p3) target bundleno = 3 (0x3), region = 82 }
 0x21e   :  { %1366 = vsyncpa [#allocation3], 1 }
 0x21f   :  { %1368 = vsyncpa [#allocation3 + $0x1], 1 }

</bundles_post_ra>
